<compile_context>
chip_gen: v6e
topology: v6e:2x2x1
jax: 0.10.0
libtpu: 0.0.40
codegen_flags: <defaults>
</compile_context>

<pallas_src>
import jax
import jax.numpy as jnp
from jax.experimental import pallas as pl
from jax.experimental.pallas import tpu as pltpu


# ---------------------------------------------------------------------------
# Host-side weight preprocessing (pure JAX, tiny tensors, runs once per call)
# ---------------------------------------------------------------------------
def _deconv_to_conv_hwio(wt):
    """ConvTranspose2d weight (Cin, Cout, 3, 3) -> equivalent Conv2d weight (HWIO).

    ConvTranspose2d(k=3, s=1, p=1) == Conv2d(k=3, p=1) with spatially flipped
    kernel and swapped channel axes: wc[dy, dx, ci, co] = wt[ci, co, 2-dy, 2-dx].
    """
    return jnp.flip(jnp.transpose(wt, (2, 3, 0, 1)), axis=(0, 1))


def _banded_weight(wc_hwio, width):
    """Fold the dx taps + horizontal zero-padding of a 3x3 conv into matrices.

    Returns (3, W*Cin, W*Cout): one matrix per dy tap.  Row index is
    w_in*Cin + ci over the UNPADDED input columns; column index is
    w_out*Cout + co.  Taps that would read a column outside [0, W) simply have
    no row, which is exactly the conv zero-padding semantics -> no halo columns
    anywhere, so activations stay lane-dense (W*Cout lanes).
    """
    _, _, cin, cout = wc_hwio.shape
    w_in = jnp.arange(width)
    w_out = jnp.arange(width)
    dx = w_in[:, None] - w_out[None, :] + 1          # tap offset for (w_in, w_out)
    valid = (dx >= 0) & (dx <= 2)
    dxc = jnp.clip(dx, 0, 2)
    mats = []
    for dy in range(3):
        blk = wc_hwio[dy][dxc]                       # (W, W, Cin, Cout)
        blk = jnp.where(valid[:, :, None, None], blk, 0.0)
        mats.append(jnp.transpose(blk, (0, 2, 1, 3)).reshape(width * cin,
                                                             width * cout))
    return jnp.stack(mats, axis=0)


# ---------------------------------------------------------------------------
# Fused Pallas kernel: 3 x (ConvT 3x3 + ReLU), Nb images per grid step
# ---------------------------------------------------------------------------
def _make_kernel(Nb, H, H_s):
    Rtot = Nb * H_s          # stacked rows per step (per-image slot = H_s rows)
    Rz = Rtot - 2            # rows produced by each layer's shifted matmul sum

    def kernel(x_ref, w1_ref, b1_ref, w2_ref, b2_ref, w3_ref, b3_ref,
               o_ref, buf):
        # x_ref : (Nb*H_s, W*Cin)  bf16  vertically padded, batch-stacked input
        # wK_ref: (3, K, W*Cout)   bf16  banded weights, one matrix per dy tap
        # bK_ref: (1, W*Cout)      f32   bias
        # o_ref : (Nb*H, W*Cout)   f32   lane-dense output block
        # buf   : VMEM (Nb*H_s, W*Cout) f32 padded intermediate (reused)

        # Zero the intermediate once per step; afterwards only valid rows are
        # ever stored, so halo/seam rows stay exactly 0 for all three layers.
        buf[...] = jnp.zeros_like(buf)

        def conv_relu(a16, w_ref, b_ref):
            # a16: (Rtot, K) bf16.  Full, aligned bf16 MXU operands; the dy
            # row-shift is applied to the f32 outputs (cheap value slices).
            d0 = jnp.dot(a16, w_ref[0], preferred_element_type=jnp.float32)
            d1 = jnp.dot(a16, w_ref[1], preferred_element_type=jnp.float32)
            d2 = jnp.dot(a16, w_ref[2], preferred_element_type=jnp.float32)
            z = d0[0:Rz] + d1[1:1 + Rz] + d2[2:2 + Rz]
            return jnp.maximum(z + b_ref[...], 0.0)          # f32 (Rz, W*Cout)

        # ---- layer 1 -------------------------------------------------------
        act = conv_relu(x_ref[...], w1_ref, b1_ref)
        for i in range(Nb):                                   # valid rows only
            buf[i * H_s + 1:i * H_s + 1 + H, :] = act[i * H_s:i * H_s + H, :]

        # ---- layer 2 (buf loaded once, cast to bf16 for the MXU) -----------
        act = conv_relu(buf[...].astype(jnp.bfloat16), w2_ref, b2_ref)
        for i in range(Nb):
            buf[i * H_s + 1:i * H_s + 1 + H, :] = act[i * H_s:i * H_s + H, :]

        # ---- layer 3: lane-dense (Nb*H, W*Cout) output ----------------------
        act = conv_relu(buf[...].astype(jnp.bfloat16), w3_ref, b3_ref)
        for i in range(Nb):
            o_ref[i * H:(i + 1) * H, :] = act[i * H_s:i * H_s + H, :].astype(
                o_ref.dtype)

    return kernel


def deconv_blockx3(x_nchw, params, images_per_step=None):
    """Forward pass matching DeConvBlockx3(is_bn=False, is_leaky=False)."""
    N, Cin, H, W = x_nchw.shape
    Cout = params[0][0].shape[1]
    H_s = ((H + 2 + 7) // 8) * 8          # 8-aligned per-image row slot
    K1, NC = W * Cin, W * Cout

    # Images per grid step: keep >=2 grid steps when N > 1 so both v7x
    # TensorCores get work; larger batches still pack several images per step
    # (bigger MXU M-fill, fewer ~0.35us grid-step overheads).
    if images_per_step is None:
        images_per_step = 1 if N <= 2 else N // 2
    while N % images_per_step:
        images_per_step -= 1
    Nb = images_per_step
    steps = N // Nb
    if steps > 1 and (Nb * H) % 8 != 0:   # output BlockSpec sublane rule
        Nb, steps = N, 1
    Rtot = Nb * H_s

    # Weights -> banded bf16 matrices (halo-free), biases stay f32.
    (wt1, bb1), (wt2, bb2), (wt3, bb3) = params
    wb1 = _banded_weight(_deconv_to_conv_hwio(wt1), W).astype(jnp.bfloat16)
    wb2 = _banded_weight(_deconv_to_conv_hwio(wt2), W).astype(jnp.bfloat16)
    wb3 = _banded_weight(_deconv_to_conv_hwio(wt3), W).astype(jnp.bfloat16)
    bp1 = jnp.tile(bb1, W)[None, :]
    bp2 = jnp.tile(bb2, W)[None, :]
    bp3 = jnp.tile(bb3, W)[None, :]

    # NCHW -> NHWC, vertical zero pad to the H_s slot, flatten (W, C) into the
    # lane axis, stack the batch along sublanes, cast to bf16 (halves the DMA).
    x = jnp.transpose(x_nchw, (0, 2, 3, 1))
    xp = jnp.pad(x, ((0, 0), (1, H_s - H - 1), (0, 0), (0, 0)))
    x2d = xp.reshape(N * H_s, K1).astype(jnp.bfloat16)

    flops = steps * (3 * 2 * Rtot * NC) * (K1 + 2 * NC)
    bytes_accessed = (x2d.size * 2
                      + 2 * (wb1.size + wb2.size + wb3.size)
                      + 4 * (bp1.size + bp2.size + bp3.size)
                      + 4 * N * H * NC)

    out2d = pl.pallas_call(
        _make_kernel(Nb, H, H_s),
        out_shape=jax.ShapeDtypeStruct((N * H, NC), x_nchw.dtype),
        grid_spec=pltpu.PrefetchScalarGridSpec(
            num_scalar_prefetch=0,
            grid=(steps,),
            in_specs=[
                pl.BlockSpec((Rtot, K1), lambda n: (n, 0)),
                pl.BlockSpec((3, K1, NC), lambda n: (0, 0, 0)),
                pl.BlockSpec((1, NC), lambda n: (0, 0)),
                pl.BlockSpec((3, NC, NC), lambda n: (0, 0, 0)),
                pl.BlockSpec((1, NC), lambda n: (0, 0)),
                pl.BlockSpec((3, NC, NC), lambda n: (0, 0, 0)),
                pl.BlockSpec((1, NC), lambda n: (0, 0)),
            ],
            out_specs=pl.BlockSpec((Nb * H, NC), lambda n: (n, 0)),
            scratch_shapes=[pltpu.VMEM((Rtot, NC), jnp.float32)],
        ),
        compiler_params=pltpu.CompilerParams(
            dimension_semantics=("parallel",)),
        cost_estimate=pl.CostEstimate(flops=int(flops), transcendentals=0,
                                      bytes_accessed=int(bytes_accessed)),
    )(x2d, wb1, bp1, wb2, bp2, wb3, bp3)

    out = out2d.reshape(N, H, W, Cout)
    return jnp.transpose(out, (0, 3, 1, 2))                  # NHWC -> NCHW


# ---------------------------------------------------------------------------
# Params / reference
# ---------------------------------------------------------------------------
def init_params(key, in_ch, out_ch):
    """Deterministic synthetic params in PyTorch ConvTranspose2d layout
    (weight: (in_ch, out_ch, 3, 3), bias: (out_ch,))."""
    params = []
    chans = [(in_ch, out_ch), (out_ch, out_ch), (out_ch, out_ch)]
    for i, (ci, co) in enumerate(chans):
        kw, kb = jax.random.split(jax.random.fold_in(key, i))
        fan_in = co * 3 * 3
        bound = 1.0 / (fan_in ** 0.5)
        wt = jax.random.uniform(kw, (ci, co, 3, 3), jnp.float32,
                                minval=-bound, maxval=bound)
        b = jax.random.uniform(kb, (co,), jnp.float32,
                               minval=-bound, maxval=bound)
        params.append((wt, b))
    return params


def _reference(x_nchw, params):
    """Pure-JAX f32 reference: ConvTranspose2d(3x3, s=1, p=1) == Conv2d(3x3, p=1)
    with flipped kernel and swapped channel axes; then ReLU."""
    x = x_nchw
    for wt, b in params:
        w_oihw = jnp.flip(jnp.transpose(wt, (1, 0, 2, 3)), axis=(2, 3))
        y = jax.lax.conv_general_dilated(
            x, w_oihw, window_strides=(1, 1), padding=((1, 1), (1, 1)),
            dimension_numbers=("NCHW", "OIHW", "NCHW"))
        x = jnp.maximum(y + b.reshape(1, -1, 1, 1), 0.0)
    return x


if __name__ == "__main__":
    key = jax.random.PRNGKey(0)
    in_ch, out_ch = 4, 8
    N, H, W = 2, 16, 16

    kx, kp = jax.random.split(key)
    x = jax.random.normal(kx, (N, in_ch, H, W), jnp.float32)   # NCHW like PyTorch
    params = init_params(kp, in_ch, out_ch)

    out = deconv_blockx3(x, params)
    out = jax.block_until_ready(out)
    assert out.shape == (N, out_ch, H, W), out.shape

    ref = _reference(x, params)
    # bf16 MXU operands (f32 accumulation): tolerance loosened vs pure f32.
    err = float(jnp.max(jnp.abs(out - ref)))
    assert jnp.allclose(out, ref, atol=3e-2, rtol=3e-2), err

    print("KERNEL_OK")
</pallas_src>

<mosaic_0001>
module attributes {stable_mosaic.version = 11 : i64} {
  func.func @kernel(%arg0: i32, %arg1: memref<24x64xbf16, #tpu.memory_space<vmem>>, %arg2: memref<3x64x128xbf16, #tpu.memory_space<vmem>>, %arg3: memref<1x128xf32, #tpu.memory_space<vmem>>, %arg4: memref<3x128x128xbf16, #tpu.memory_space<vmem>>, %arg5: memref<1x128xf32, #tpu.memory_space<vmem>>, %arg6: memref<3x128x128xbf16, #tpu.memory_space<vmem>>, %arg7: memref<1x128xf32, #tpu.memory_space<vmem>>, %arg8: memref<16x128xf32, #tpu.memory_space<vmem>>, %arg9: memref<24x128xf32, #tpu.memory_space<vmem>>) attributes {dimension_semantics = [#tpu.dimension_semantics<parallel>], iteration_bounds = array<i64: 2>, scalar_prefetch = 0 : i64, scratch_operands = 1 : i64, tpu.core_type = #tpu.core_type<tc>, window_params = [{transform_indices = @transform_0, window_bounds = array<i64: 24, 64>}, {pipeline_mode = #tpu.pipeline_mode<synchronous>, transform_indices = @transform_1, window_bounds = array<i64: 3, 64, 128>}, {pipeline_mode = #tpu.pipeline_mode<synchronous>, transform_indices = @transform_2, window_bounds = array<i64: 1, 128>}, {pipeline_mode = #tpu.pipeline_mode<synchronous>, transform_indices = @transform_3, window_bounds = array<i64: 3, 128, 128>}, {pipeline_mode = #tpu.pipeline_mode<synchronous>, transform_indices = @transform_4, window_bounds = array<i64: 1, 128>}, {pipeline_mode = #tpu.pipeline_mode<synchronous>, transform_indices = @transform_5, window_bounds = array<i64: 3, 128, 128>}, {pipeline_mode = #tpu.pipeline_mode<synchronous>, transform_indices = @transform_6, window_bounds = array<i64: 1, 128>}, {transform_indices = @transform_7, window_bounds = array<i64: 16, 128>}]} {
    %cst = arith.constant 0.000000e+00 : f32
    %0 = vector.broadcast %cst : f32 to vector<24x128xf32>
    %c0 = arith.constant 0 : index
    %c0_0 = arith.constant 0 : index
    %1 = vector.load %arg9[%c0, %c0_0] : memref<24x128xf32, #tpu.memory_space<vmem>>, vector<24x128xf32>
    tpu.vector_store %arg9[%c0, %c0_0], %0 {strides = array<i32>} : memref<24x128xf32, #tpu.memory_space<vmem>>, vector<24x128xf32>,
    %c0_1 = arith.constant 0 : index
    %c0_2 = arith.constant 0 : index
    %2 = vector.load %arg1[%c0_1, %c0_2] : memref<24x64xbf16, #tpu.memory_space<vmem>>, vector<24x64xbf16>
    %c0_3 = arith.constant 0 : index
    %c0_4 = arith.constant 0 : index
    %c0_5 = arith.constant 0 : index
    %3 = vector.load %arg2[%c0_3, %c0_4, %c0_5] : memref<3x64x128xbf16, #tpu.memory_space<vmem>>, vector<1x64x128xbf16>
    %4 = vector.shape_cast %3 : vector<1x64x128xbf16> to vector<64x128xbf16>
    %cst_6 = arith.constant dense<0.000000e+00> : vector<24x128xf32>
    %5 = tpu.matmul %2, %4, %cst_6 {dimension_numbers = #tpu.dot_dimension_numbers<[1], [0], [0], [1], [0, 0, 1, 1], [], []>} : vector<24x64xbf16>, vector<64x128xbf16>, vector<24x128xf32> -> vector<24x128xf32>
    %c1 = arith.constant 1 : index
    %c0_7 = arith.constant 0 : index
    %c0_8 = arith.constant 0 : index
    %6 = vector.load %arg2[%c1, %c0_7, %c0_8] : memref<3x64x128xbf16, #tpu.memory_space<vmem>>, vector<1x64x128xbf16>
    %7 = vector.shape_cast %6 : vector<1x64x128xbf16> to vector<64x128xbf16>
    %cst_9 = arith.constant dense<0.000000e+00> : vector<24x128xf32>
    %8 = tpu.matmul %2, %7, %cst_9 {dimension_numbers = #tpu.dot_dimension_numbers<[1], [0], [0], [1], [0, 0, 1, 1], [], []>} : vector<24x64xbf16>, vector<64x128xbf16>, vector<24x128xf32> -> vector<24x128xf32>
    %c2 = arith.constant 2 : index
    %c0_10 = arith.constant 0 : index
    %c0_11 = arith.constant 0 : index
    %9 = vector.load %arg2[%c2, %c0_10, %c0_11] : memref<3x64x128xbf16, #tpu.memory_space<vmem>>, vector<1x64x128xbf16>
    %10 = vector.shape_cast %9 : vector<1x64x128xbf16> to vector<64x128xbf16>
    %cst_12 = arith.constant dense<0.000000e+00> : vector<24x128xf32>
    %11 = tpu.matmul %2, %10, %cst_12 {dimension_numbers = #tpu.dot_dimension_numbers<[1], [0], [0], [1], [0, 0, 1, 1], [], []>} : vector<24x64xbf16>, vector<64x128xbf16>, vector<24x128xf32> -> vector<24x128xf32>
    %12 = vector.extract_strided_slice %5 {offsets = [0, 0], sizes = [22, 128], strides = [1, 1]} : vector<24x128xf32> to vector<22x128xf32>
    %13 = vector.extract_strided_slice %8 {offsets = [1, 0], sizes = [22, 128], strides = [1, 1]} : vector<24x128xf32> to vector<22x128xf32>
    %14 = arith.addf %12, %13 : vector<22x128xf32>
    %15 = vector.extract_strided_slice %11 {offsets = [2, 0], sizes = [22, 128], strides = [1, 1]} : vector<24x128xf32> to vector<22x128xf32>
    %16 = arith.addf %14, %15 : vector<22x128xf32>
    %c0_13 = arith.constant 0 : index
    %c0_14 = arith.constant 0 : index
    %17 = vector.load %arg3[%c0_13, %c0_14] : memref<1x128xf32, #tpu.memory_space<vmem>>, vector<1x128xf32>
    %18 = vector.broadcast %17 : vector<1x128xf32> to vector<22x128xf32>
    %19 = arith.addf %16, %18 : vector<22x128xf32>
    %cst_15 = arith.constant 0.000000e+00 : f32
    %20 = vector.broadcast %cst_15 : f32 to vector<22x128xf32>
    %21 = arith.maximumf %19, %20 : vector<22x128xf32>
    %22 = vector.extract_strided_slice %21 {offsets = [0, 0], sizes = [16, 128], strides = [1, 1]} : vector<22x128xf32> to vector<16x128xf32>
    %c1_16 = arith.constant 1 : index
    %c0_17 = arith.constant 0 : index
    %23 = vector.load %arg9[%c1_16, %c0_17] : memref<24x128xf32, #tpu.memory_space<vmem>>, vector<16x128xf32>
    tpu.vector_store %arg9[%c1_16, %c0_17], %22 {strides = array<i32>} : memref<24x128xf32, #tpu.memory_space<vmem>>, vector<16x128xf32>,
    %c0_18 = arith.constant 0 : index
    %c0_19 = arith.constant 0 : index
    %24 = vector.load %arg9[%c0_18, %c0_19] : memref<24x128xf32, #tpu.memory_space<vmem>>, vector<24x128xf32>
    %25 = arith.truncf %24 : vector<24x128xf32> to vector<24x128xbf16>
    %c0_20 = arith.constant 0 : index
    %c0_21 = arith.constant 0 : index
    %c0_22 = arith.constant 0 : index
    %26 = vector.load %arg4[%c0_20, %c0_21, %c0_22] : memref<3x128x128xbf16, #tpu.memory_space<vmem>>, vector<1x128x128xbf16>
    %27 = vector.shape_cast %26 : vector<1x128x128xbf16> to vector<128x128xbf16>
    %cst_23 = arith.constant dense<0.000000e+00> : vector<24x128xf32>
    %28 = tpu.matmul %25, %27, %cst_23 {dimension_numbers = #tpu.dot_dimension_numbers<[1], [0], [0], [1], [0, 0, 1, 1], [], []>} : vector<24x128xbf16>, vector<128x128xbf16>, vector<24x128xf32> -> vector<24x128xf32>
    %c1_24 = arith.constant 1 : index
    %c0_25 = arith.constant 0 : index
    %c0_26 = arith.constant 0 : index
    %29 = vector.load %arg4[%c1_24, %c0_25, %c0_26] : memref<3x128x128xbf16, #tpu.memory_space<vmem>>, vector<1x128x128xbf16>
    %30 = vector.shape_cast %29 : vector<1x128x128xbf16> to vector<128x128xbf16>
    %cst_27 = arith.constant dense<0.000000e+00> : vector<24x128xf32>
    %31 = tpu.matmul %25, %30, %cst_27 {dimension_numbers = #tpu.dot_dimension_numbers<[1], [0], [0], [1], [0, 0, 1, 1], [], []>} : vector<24x128xbf16>, vector<128x128xbf16>, vector<24x128xf32> -> vector<24x128xf32>
    %c2_28 = arith.constant 2 : index
    %c0_29 = arith.constant 0 : index
    %c0_30 = arith.constant 0 : index
    %32 = vector.load %arg4[%c2_28, %c0_29, %c0_30] : memref<3x128x128xbf16, #tpu.memory_space<vmem>>, vector<1x128x128xbf16>
    %33 = vector.shape_cast %32 : vector<1x128x128xbf16> to vector<128x128xbf16>
    %cst_31 = arith.constant dense<0.000000e+00> : vector<24x128xf32>
    %34 = tpu.matmul %25, %33, %cst_31 {dimension_numbers = #tpu.dot_dimension_numbers<[1], [0], [0], [1], [0, 0, 1, 1], [], []>} : vector<24x128xbf16>, vector<128x128xbf16>, vector<24x128xf32> -> vector<24x128xf32>
    %35 = vector.extract_strided_slice %28 {offsets = [0, 0], sizes = [22, 128], strides = [1, 1]} : vector<24x128xf32> to vector<22x128xf32>
    %36 = vector.extract_strided_slice %31 {offsets = [1, 0], sizes = [22, 128], strides = [1, 1]} : vector<24x128xf32> to vector<22x128xf32>
    %37 = arith.addf %35, %36 : vector<22x128xf32>
    %38 = vector.extract_strided_slice %34 {offsets = [2, 0], sizes = [22, 128], strides = [1, 1]} : vector<24x128xf32> to vector<22x128xf32>
    %39 = arith.addf %37, %38 : vector<22x128xf32>
    %c0_32 = arith.constant 0 : index
    %c0_33 = arith.constant 0 : index
    %40 = vector.load %arg5[%c0_32, %c0_33] : memref<1x128xf32, #tpu.memory_space<vmem>>, vector<1x128xf32>
    %41 = vector.broadcast %40 : vector<1x128xf32> to vector<22x128xf32>
    %42 = arith.addf %39, %41 : vector<22x128xf32>
    %cst_34 = arith.constant 0.000000e+00 : f32
    %43 = vector.broadcast %cst_34 : f32 to vector<22x128xf32>
    %44 = arith.maximumf %42, %43 : vector<22x128xf32>
    %45 = vector.extract_strided_slice %44 {offsets = [0, 0], sizes = [16, 128], strides = [1, 1]} : vector<22x128xf32> to vector<16x128xf32>
    %c1_35 = arith.constant 1 : index
    %c0_36 = arith.constant 0 : index
    %46 = vector.load %arg9[%c1_35, %c0_36] : memref<24x128xf32, #tpu.memory_space<vmem>>, vector<16x128xf32>
    tpu.vector_store %arg9[%c1_35, %c0_36], %45 {strides = array<i32>} : memref<24x128xf32, #tpu.memory_space<vmem>>, vector<16x128xf32>,
    %c0_37 = arith.constant 0 : index
    %c0_38 = arith.constant 0 : index
    %47 = vector.load %arg9[%c0_37, %c0_38] : memref<24x128xf32, #tpu.memory_space<vmem>>, vector<24x128xf32>
    %48 = arith.truncf %47 : vector<24x128xf32> to vector<24x128xbf16>
    %c0_39 = arith.constant 0 : index
    %c0_40 = arith.constant 0 : index
    %c0_41 = arith.constant 0 : index
    %49 = vector.load %arg6[%c0_39, %c0_40, %c0_41] : memref<3x128x128xbf16, #tpu.memory_space<vmem>>, vector<1x128x128xbf16>
    %50 = vector.shape_cast %49 : vector<1x128x128xbf16> to vector<128x128xbf16>
    %cst_42 = arith.constant dense<0.000000e+00> : vector<24x128xf32>
    %51 = tpu.matmul %48, %50, %cst_42 {dimension_numbers = #tpu.dot_dimension_numbers<[1], [0], [0], [1], [0, 0, 1, 1], [], []>} : vector<24x128xbf16>, vector<128x128xbf16>, vector<24x128xf32> -> vector<24x128xf32>
    %c1_43 = arith.constant 1 : index
    %c0_44 = arith.constant 0 : index
    %c0_45 = arith.constant 0 : index
    %52 = vector.load %arg6[%c1_43, %c0_44, %c0_45] : memref<3x128x128xbf16, #tpu.memory_space<vmem>>, vector<1x128x128xbf16>
    %53 = vector.shape_cast %52 : vector<1x128x128xbf16> to vector<128x128xbf16>
    %cst_46 = arith.constant dense<0.000000e+00> : vector<24x128xf32>
    %54 = tpu.matmul %48, %53, %cst_46 {dimension_numbers = #tpu.dot_dimension_numbers<[1], [0], [0], [1], [0, 0, 1, 1], [], []>} : vector<24x128xbf16>, vector<128x128xbf16>, vector<24x128xf32> -> vector<24x128xf32>
    %c2_47 = arith.constant 2 : index
    %c0_48 = arith.constant 0 : index
    %c0_49 = arith.constant 0 : index
    %55 = vector.load %arg6[%c2_47, %c0_48, %c0_49] : memref<3x128x128xbf16, #tpu.memory_space<vmem>>, vector<1x128x128xbf16>
    %56 = vector.shape_cast %55 : vector<1x128x128xbf16> to vector<128x128xbf16>
    %cst_50 = arith.constant dense<0.000000e+00> : vector<24x128xf32>
    %57 = tpu.matmul %48, %56, %cst_50 {dimension_numbers = #tpu.dot_dimension_numbers<[1], [0], [0], [1], [0, 0, 1, 1], [], []>} : vector<24x128xbf16>, vector<128x128xbf16>, vector<24x128xf32> -> vector<24x128xf32>
    %58 = vector.extract_strided_slice %51 {offsets = [0, 0], sizes = [22, 128], strides = [1, 1]} : vector<24x128xf32> to vector<22x128xf32>
    %59 = vector.extract_strided_slice %54 {offsets = [1, 0], sizes = [22, 128], strides = [1, 1]} : vector<24x128xf32> to vector<22x128xf32>
    %60 = arith.addf %58, %59 : vector<22x128xf32>
    %61 = vector.extract_strided_slice %57 {offsets = [2, 0], sizes = [22, 128], strides = [1, 1]} : vector<24x128xf32> to vector<22x128xf32>
    %62 = arith.addf %60, %61 : vector<22x128xf32>
    %c0_51 = arith.constant 0 : index
    %c0_52 = arith.constant 0 : index
    %63 = vector.load %arg7[%c0_51, %c0_52] : memref<1x128xf32, #tpu.memory_space<vmem>>, vector<1x128xf32>
    %64 = vector.broadcast %63 : vector<1x128xf32> to vector<22x128xf32>
    %65 = arith.addf %62, %64 : vector<22x128xf32>
    %cst_53 = arith.constant 0.000000e+00 : f32
    %66 = vector.broadcast %cst_53 : f32 to vector<22x128xf32>
    %67 = arith.maximumf %65, %66 : vector<22x128xf32>
    %68 = vector.extract_strided_slice %67 {offsets = [0, 0], sizes = [16, 128], strides = [1, 1]} : vector<22x128xf32> to vector<16x128xf32>
    %c0_54 = arith.constant 0 : index
    %c0_55 = arith.constant 0 : index
    %69 = vector.load %arg8[%c0_54, %c0_55] : memref<16x128xf32, #tpu.memory_space<vmem>>, vector<16x128xf32>
    tpu.vector_store %arg8[%c0_54, %c0_55], %68 {strides = array<i32>} : memref<16x128xf32, #tpu.memory_space<vmem>>, vector<16x128xf32>,
    return
  }
  func.func @transform_0(%arg0: i32) -> (i32, i32) {
    %c0_i32 = arith.constant 0 : i32
    %c0_i32_0 = arith.constant 0 : i32
    return %arg0, %c0_i32 : i32, i32
  }
  func.func @transform_1(%arg0: i32) -> (i32, i32, i32) {
    %c0_i32 = arith.constant 0 : i32
    %c0_i32_0 = arith.constant 0 : i32
    %c0_i32_1 = arith.constant 0 : i32
    %c0_i32_2 = arith.constant 0 : i32
    return %c0_i32, %c0_i32_0, %c0_i32_1 : i32, i32, i32
  }
  func.func @transform_2(%arg0: i32) -> (i32, i32) {
    %c0_i32 = arith.constant 0 : i32
    %c0_i32_0 = arith.constant 0 : i32
    %c0_i32_1 = arith.constant 0 : i32
    return %c0_i32, %c0_i32_0 : i32, i32
  }
  func.func @transform_3(%arg0: i32) -> (i32, i32, i32) {
    %c0_i32 = arith.constant 0 : i32
    %c0_i32_0 = arith.constant 0 : i32
    %c0_i32_1 = arith.constant 0 : i32
    %c0_i32_2 = arith.constant 0 : i32
    return %c0_i32, %c0_i32_0, %c0_i32_1 : i32, i32, i32
  }
  func.func @transform_4(%arg0: i32) -> (i32, i32) {
    %c0_i32 = arith.constant 0 : i32
    %c0_i32_0 = arith.constant 0 : i32
    %c0_i32_1 = arith.constant 0 : i32
    return %c0_i32, %c0_i32_0 : i32, i32
  }
  func.func @transform_5(%arg0: i32) -> (i32, i32, i32) {
    %c0_i32 = arith.constant 0 : i32
    %c0_i32_0 = arith.constant 0 : i32
    %c0_i32_1 = arith.constant 0 : i32
    %c0_i32_2 = arith.constant 0 : i32
    return %c0_i32, %c0_i32_0, %c0_i32_1 : i32, i32, i32
  }
  func.func @transform_6(%arg0: i32) -> (i32, i32) {
    %c0_i32 = arith.constant 0 : i32
    %c0_i32_0 = arith.constant 0 : i32
    %c0_i32_1 = arith.constant 0 : i32
    return %c0_i32, %c0_i32_0 : i32, i32
  }
  func.func @transform_7(%arg0: i32) -> (i32, i32) {
    %c0_i32 = arith.constant 0 : i32
    %c0_i32_0 = arith.constant 0 : i32
    return %arg0, %c0_i32 : i32, i32
  }
}

</mosaic_0001>

<bundles_post_ra>
// kernel: tpu_custom_call.1
= control target key start
LH: loop header
LB: loop body
LE: loop exit
PB: predicated region body
PF: predicated region fallthrough
CT: control target
= control target key end

     0   :  { %s2463_s0 = inlined_call_operand.hbm [shape: bf16[48,64], index: 0, kind: input, shape index: {}]   ;;  %s2464_s1 = inlined_call_operand.hbm [shape: bf16[3,64,128], index: 1, kind: input, shape index: {}]   ;;  %s2465_s2 = inlined_call_operand.vmem [shape: f32[1,128], index: 2, kind: input, shape index: {}]   ;;  %s2466_s3 = inlined_call_operand.hbm [shape: bf16[3,128,128], index: 3, kind: input, shape index: {}]   ;;  %s2467_s4 = inlined_call_operand.vmem [shape: f32[1,128], index: 4, kind: input, shape index: {}]   ;;  %s2468_s5 = inlined_call_operand.hbm [shape: bf16[3,128,128], index: 5, kind: input, shape index: {}]   ;;  %s2469_s6 = inlined_call_operand.vmem [shape: f32[1,128], index: 6, kind: input, shape index: {}]   ;;  %s2470_s7 = inlined_call_operand.hbm [shape: f32[32,128], index: 7, kind: output, shape index: {}]  }
   0x1   :  { %2477 = sst [smem:[#allocation16_spill]] %s2464_s1 }
   0x2   :  { %12 = vsyncpa [#allocation4], 0 }
   0x3   :  { %14 = vsyncpa [#allocation4 + $0x1], 0 }
   0x4   :  { %15 = vsyncpa [#allocation7], 0 }
   0x5   :  { %16 = vsyncpa [#allocation10], 0 }
   0x6   :  { %17 = vsyncpa [#allocation5], 0 }
   0x7   :  { %19 = vsyncpa [#allocation5 + $0x1], 0  ;;  %s2219_s24 = smov 0   ;;  %s2221_s25 = smov 0  }
   0x8   :  { %s2223_s26 = smov 0   ;;  %s2225_s27 = smov 0  }
   0x9 LB: > { %s2240_s28 = sadd.s32 4294967295, %s2167_s27   ;;  %s1519_s29 = sadd.s32 4294967294, %s2167_s27   ;;  %s2167_s27 = sphi %s2225_s27, %s2499_s27   ;;  %s2163_s26 = sphi %s2223_s26, %s2498_s26   ;;  %s2159_s25 = sphi %s2221_s25, %s2497_s25   ;;  %s2155_s24 = sphi %s2219_s24, %s2496_s24  }
   0xa   : > { %p45_p0 = scmp.ne.s32.totalorder %s2159_s25, %s2155_s24  ;;  %p2471_p1 = scmp.eq.s32.totalorder %s2240_s28, 0 }
   0xb   : > { %p195_p2 = scmp.eq.s32.totalorder %s2240_s28, 1  ;;  %p201_p3 = scmp.eq.s32.totalorder %s1519_s29, 1 }
   0xc   : > { %p2249_p4 = por %p2471_p1, %p45_p0  ;;  %p1520_p5 = scmp.ge.s32.totalorder %s2167_s27, 1 }
   0xd   : > { %p2254_p6 = por %p201_p3, %p45_p0  ;;  %p208_p7 = scmp.lt.s32.totalorder %s2167_s27, 3 }
   0xe   : > { %s2478_s30 = scalar_select %p2249_p4, 1, 0 }
   0xf   : > { %s2479_s8 = scalar_select %p2254_p6, 1, 0 }
  0x10   : > { %p2259_p8 = pnand %p1520_p5, %p208_p7  ;;  %s2169_s10 = smov [#allocation6]  }
  0x11   : > { %s220_s11 = sshll.u32 %s2169_s10, 4  ;;  %s2170_s13 = smov [#allocation8]   ;;  %s221_s11 = int_to_ptr.vmem [resolvable:$true] %s220_s11 }
  0x12   : > { %s2480_s9 = scalar_select %p2259_p8, 1, 0 }
  0x13   : > { %p1861_p9 = pneg %p2259_p8  ;;  %s236_s14 = sshll.u32 %s2170_s13, 4  ;;  %s237_s14 = int_to_ptr.vmem [resolvable:$true] %s236_s14 }
  0x14   : > { %s2171_s15 = smov [#allocation9]   ;;  %s2000_s17 = scalar_lea.vmem %s221_s11, 1536 }
  0x15   : > { %p2268_p11 = pnand %p1861_p9, %p2471_p1  ;;  %s252_s16 = sshll.u32 %s2171_s15, 4  ;;  %s253_s16 = int_to_ptr.vmem [resolvable:$true] %s252_s16 }
  0x16   : > { %p2001_p13 = scmp.ne.s32.totalorder %s221_s11, %s2000_s17  ;;  %p2008_p5 = scmp.lt.s32.totalorder %s221_s11, %s221_s11 }
  0x17   : > { %p1991_p12 = pneg %p2268_p11  ;;  %p2009_p7 = scmp.lt.s32.totalorder %s2000_s17, %s2000_s17 }
  0x19   : > { %p2003_p0 = pnand %p2001_p13, %p1991_p12  ;;  %p2010_p9 = por %p2009_p7, %p2008_p5 }
  0x1b   : > { %p2004_p3 = pneg %p2003_p0 }
  0x1d   : > { %p2011_p10 = pnand %p2010_p9, %p2004_p3 }
  0x1f   : > { %2014 = shalt.err (!%p2011_p10)
}
  0x20   : > { %s2472_s18 = smov 64   ;;  %s2473_s19 = smov 4  }
  0x21   : > { %s2482_s1 = sld [smem:[#allocation16_spill]]  ;;  %s2026_s22 = scalar_lea.vmem %s237_s14, 3072 }
  0x22   : > { %p2027_p13 = scmp.ne.s32.totalorder %s237_s14, %s2026_s22  ;;  %p2034_p3 = scmp.lt.s32.totalorder %s237_s14, %s237_s14 }
  0x23   : > { %p2035_p10 = scmp.lt.s32.totalorder %s2026_s22, %s2026_s22 }
  0x24   : > { %p2029_p0 = pnand %p2027_p13, %p1991_p12 }
  0x25   : > { %p2036_p7 = por %p2035_p10, %p2034_p3 }
  0x26   : > { %p2030_p5 = pneg %p2029_p0 }
  0x27   : > { %1864 = dma.hbm_to_vmem [thread:$0]  (!%p2268_p11), %s2482_s1, 1536, %s221_s11, [#allocation7], %s2472_s18, %s2472_s18, %s2473_s19  }
  0x28   : > { %p2037_p9 = pnand %p2036_p7, %p2030_p5 }
  0x2a   : > { %2040 = shalt.err (!%p2037_p9)
}
  0x2b   : > { %1867 = dma.hbm_to_vmem [thread:$0]  (!%p2268_p11), %s2466_s3, 3072, %s237_s14, [#allocation7], %s2472_s18, %s2472_s18, %s2473_s19  }
  0x2c   : > { %s2052_s10 = scalar_lea.vmem %s253_s16, 3072  ;;  %p2060_p3 = scmp.lt.s32.totalorder %s253_s16, %s253_s16 }
  0x2d   : > { %p2053_p1 = scmp.ne.s32.totalorder %s253_s16, %s2052_s10  ;;  %p2061_p5 = scmp.lt.s32.totalorder %s2052_s10, %s2052_s10 }
  0x2f   : > { %p2055_p13 = pnand %p2053_p1, %p1991_p12  ;;  %p2062_p10 = por %p2061_p5, %p2060_p3 }
  0x31   : > { %p2056_p0 = pneg %p2055_p13 }
  0x33   : > { %p2063_p7 = pnand %p2062_p10, %p2056_p0 }
  0x35   : > { %2066 = shalt.err (!%p2063_p7)
}
  0x36   : > { %1870 = dma.hbm_to_vmem [thread:$0]  (!%p2268_p11), %s2468_s5, 3072, %s253_s16, [#allocation10], %s2472_s18, %s2472_s18, %s2473_s19  }
  0x37   : > { %s2308_s14 = sadd.s32 1, %s2167_s27   ;;  %s32_s15 = sadd.s32 1, %s2163_s26 }
  0x38   : > { %s29_s12 = ssub.s32 %s2167_s27, %s2308_s14  ;;  %p39_p12 = scmp.ne.s32.totalorder %s2163_s26, %s2159_s25 }
  0x39   : > { %p30_p1 = scmp.eq.s32.totalorder %s29_s12, 0  ;;  %p40_p9 = scmp.eq.s32.totalorder %s2167_s27, 0 }
  0x3a   : > { %p1882_p13 = scmp.lt.s32.totalorder %s2167_s27, 2  ;;  %p2322_p3 = por %p195_p2, %p39_p12 }
  0x3b   : > { %s2318_s17 = scalar_select %p30_p1, %s2163_s26, %s32_s15  }
  0x3c   : > { %p41_p0 = por %p40_p9, %p39_p12  ;;  %s269_s21 = sand.u32 1, %s2163_s26  }
  0x3d   : > { %s2483_s20 = scalar_select %p2322_p3, 1, 0 }
  0x3e   : > { %s1607_s22 = smul.u32 192, %s2167_s27  ;;  %p2328_p11 = pnand %p1882_p13, %p41_p0 }
  0x3f   : > { %s1843_s16 = smul.u32 12, %s269_s21  ;;  %s2339_s15 = scalar_lea.sflag [#allocation4], %s269_s21 }
  0x40   : > { %s2335_s11 = scalar_lea.hbm %s2463_s0, %s1607_s22  ;;  %p2069_p5 = pneg %p2328_p11 }
  0x41   : > { %s273_s13 = scalar_lea.vmem [#allocation3], %s1843_s16  ;;  %s2067_s18 = scalar_lea.hbm %s2335_s11, 192 }
  0x42   : > { %s280_s12 = sshll.u32 %s273_s13, 4  ;;  %p2068_p2 = scmp.ne.s32.totalorder %s2335_s11, %s2067_s18  ;;  %s2337_s12 = int_to_ptr.vmem [resolvable:$true] %s280_s12 }
  0x43   : > { %s2072_s22 = scalar_lea.hbm %s2463_s0, 384  ;;  %p2073_p1 = scmp.lt.s32.totalorder %s2335_s11, %s2463_s0 }
  0x44   : > { %p2070_p10 = pnand %p2069_p5, %p2068_p2  ;;  %p2074_p12 = scmp.lt.s32.totalorder %s2072_s22, %s2067_s18 }
  0x46   : > { %p2071_p7 = pneg %p2070_p10  ;;  %p2075_p9 = por %p2074_p12, %p2073_p1 }
  0x48   : > { %p2076_p13 = pnand %p2075_p9, %p2071_p7 }
  0x4a   : > { %2079 = shalt.err (!%p2076_p13)
}
  0x4b   : > { %s2080_s21 = scalar_lea.vmem %s2337_s12, 192  ;;  %s2174_s16 = smov [#allocation3]  }
  0x4c   : > { %p2081_p0 = scmp.ne.s32.totalorder %s2337_s12, %s2080_s21  ;;  %s2085_s13 = sshll.u32 %s2174_s16, 4  ;;  %s2086_s13 = int_to_ptr.vmem [resolvable:$false] %s2085_s13 }
  0x4d   : > { %s2087_s19 = scalar_lea.vmem %s2086_s13, 384  ;;  %p2088_p10 = scmp.lt.s32.totalorder %s2337_s12, %s2086_s13 }
  0x4e   : > { %p2083_p6 = pnand %p2081_p0, %p2069_p5  ;;  %p2089_p3 = scmp.lt.s32.totalorder %s2087_s19, %s2080_s21 }
  0x50   : > { %p2084_p2 = pneg %p2083_p6  ;;  %p2090_p4 = por %p2089_p3, %p2088_p10 }
  0x52   : > { %p2091_p8 = pnand %p2090_p4, %p2084_p2 }
  0x54   : > { %2094 = shalt.err (!%p2091_p8)
}
  0x55   : > { %s2485_s1 = smov 4   ;;  %s2486_s18 = smov 64  }
  0x56   : > { %1874 = dma.hbm_to_vmem [thread:$0]  (!%p2328_p11), %s2335_s11, 192, %s2337_s12, %s2339_s15, %s2486_s18, %s2486_s18, %s2485_s1  }
  0x57   : > { %p2487_p6 = scmp.ne.s32.totalorder %s2480_s9, 0 }
  0x58   : > { %s2366_s29 = sand.u32 (!%p2487_p6), 1, %s2159_s25   ;;  %p2488_p4 = scmp.ne.s32.totalorder (!%p2487_p6), %s2478_s30, 0 }
  0x59   : > { %292 = sbr.rel (%p2487_p6) target bundleno = 859 (0x35b), region = 48  ;;  %s295_s10 = scalar_lea.sflag (!%p2487_p6), [#allocation4], %s2366_s29 }
  0x5a   : > { %s1844_s22 = smul.u32 (!%p2487_p6), 12, %s2366_s29 }
  0x5c   : > { %s2370_s21 = scalar_lea.vmem (!%p2487_p6), [#allocation3], %s1844_s22 }
  0x5e   : > { %2138 = dma.done.wait (%p2488_p4), %s295_s10, 192  }
  0x5f   : > { %2140 = vsyncadd (%p2488_p4), %s295_s10, 4294967104  ;;  %p2489_p8 = scmp.eq.s32.totalorder %s2240_s28, 0 }
  0x61   : > { %2142 = dma.done.wait (%p2489_p8), [#allocation7], 4608   ;;  %p2490_p3 = pmov %p2489_p8 }
  0x63   : > { %2144 = vsyncadd (%p2490_p3), [#allocation7], 4294962688  ;;  %p2491_p11 = pmov %p2490_p3 }
  0x64   : > { %p2492_p5 = pmov %p2490_p3 }
  0x65   : > { %2146 = dma.done.wait (%p2491_p11), [#allocation10], 3072  }
  0x66   : > { %2148 = vsyncadd (%p2492_p5), [#allocation10], 4294964224  ;;  %v1927_v0 = vld [vmem:[#allocation6 + $0x18] sm:$0xff]   ;;  %v1929_v2 = vld [vmem:[#allocation6 + $0x10] sm:$0xff]   ;;  %vm390_vm0 = vcmask 523264   ;;  %v2175_v20 = vmov 0.0  }
  0x67   : > { %v1928_v1 = vld [vmem:[#allocation6 + $0x38] sm:$0xff]   ;;  %1687 = vmatprep.subr.bf16.mxu0 %v1927_v0  ;;  %v1930_v3 = vld [vmem:[#allocation6 + $0x30] sm:$0xff]   ;;  %v1931_v4 = vld [vmem:[#allocation6 + $0x8] sm:$0xff]   ;;  %344 = vst [vmem:[#allocation2] sm:$0xff] %v2175_v20  ;;  %vm609_vm1 = vcmask 1046528   ;;  %vm622_vm2 = vcmask 1045504  }
  0x68   : > { %1699 = vmatprep.subr.bf16.mxu1 %v1928_v1  ;;  %1688 = vmatpush3.bf16.msra.mxu0 %v1927_v0  ;;  %v1932_v5 = vld [vmem:[#allocation6 + $0x28] sm:$0xff]   ;;  %v1933_v6 = vld [vmem:[#allocation6] sm:$0xff]   ;;  %v1937_v9 = vld [vmem:[#allocation6 + $0x58] sm:$0xff]   ;;  %345 = vst [vmem:[#allocation2 + $0x8] sm:$0xff] %v2175_v20  ;;  %s1530_s12 = sshll.u32 %s2366_s29, 4  ;;  %s1608_s13 = sshll.u32 %s2240_s28, 8 }
  0x69   : > { %1700 = vmatpush3.bf16.msra.mxu1 %v1928_v1  ;;  %1689 = vmatprep.subr.bf16.mxu0 %v1929_v2  ;;  %v1935_v7 = vld [vmem:[%s2370_s21] sm:$0xff]   ;;  %v1934_v8 = vld [vmem:[#allocation6 + $0x20] sm:$0xff]   ;;  %v1936_v10 = vld [vmem:[%s2370_s21 + $0x8] ss:$0 sps:$4 sm:$0xff]   ;;  %346 = vst [vmem:[#allocation2 + $0x10] sm:$0xff] %v2175_v20  ;;  %s340_s19 = scalar_lea.vmem [#allocation11], %s1530_s12  ;;  %s2418_s10 = scalar_lea.hbm %s2470_s7, %s1608_s13 }
  0x6a   : > { %1701 = vmatprep.subr.bf16.mxu1 %v1930_v3  ;;  %1695 = vmatprep.mubr.msk.bf16.mxu0 %vm390_vm0, %v1935_v7  ;;  %v1938_v11 = vld [vmem:[#allocation6 + $0x50] sm:$0xff]   ;;  %v1939_v12 = vld [vmem:[#allocation6 + $0x48] sm:$0xff]   ;;  %v1940_v13 = vld [vmem:[#allocation6 + $0x40] sm:$0xff]   ;;  %s1417_s1 = sshll.u32 %s340_s19, 4  ;;  %s1404_s21 = scalar_lea.sflag [#allocation5], %s2366_s29  ;;  %s2420_s1 = int_to_ptr.vmem [resolvable:$true] %s1417_s1 }
  0x6b   : > { %1707 = vmatprep.mubr.msk.bf16.mxu1 %vm390_vm0, %v1935_v7  ;;  %v1941_v14 = vld [vmem:[#allocation8 + $0x38] sm:$0xff]   ;;  %v1943_v16 = vld [vmem:[#allocation8 + $0x30] sm:$0xff]   ;;  %v1945_v18 = vld [vmem:[#allocation8 + $0x28] sm:$0xff]   ;;  %s2095_s28 = scalar_lea.vmem %s2420_s1, 256  ;;  %p2493_p1 = scmp.ne.s32.totalorder %s2483_s20, 0 }
  0x6c   : > { %1690 = vmatpush3.bf16.msra.mxu0 %v1929_v2  ;;  %v1942_v15 = vld [vmem:[#allocation8 + $0x78] sm:$0xff]   ;;  %v1944_v17 = vld [vmem:[#allocation8 + $0x70] sm:$0xff]   ;;  %v1946_v19 = vld [vmem:[#allocation8 + $0x68] sm:$0xff]   ;;  %p2096_p7 = scmp.ne.s32.totalorder %s2420_s1, %s2095_s28  ;;  %s2176_s30 = smov [#allocation11]  }
  0x6d   : > { %1702 = vmatpush3.bf16.msra.mxu1 %v1930_v3  ;;  %1691 = vmatprep.subr.bf16.mxu0 %v1931_v4  ;;  %v1947_v21 = vld [vmem:[#allocation8 + $0x20] sm:$0xff]   ;;  %v1949_v23 = vld [vmem:[#allocation8 + $0x18] sm:$0xff]   ;;  %v1951_v25 = vld [vmem:[#allocation8 + $0x10] sm:$0xff]   ;;  %s2099_s9 = sshll.u32 %s2176_s30, 4  ;;  %s2100_s9 = int_to_ptr.vmem [resolvable:$false] %s2099_s9 }
  0x6e   : > { %1703 = vmatprep.subr.bf16.mxu1 %v1932_v5  ;;  %v1948_v22 = vld [vmem:[#allocation8 + $0x60] sm:$0xff]   ;;  %v1950_v24 = vld [vmem:[#allocation8 + $0x58] sm:$0xff]   ;;  %v1952_v26 = vld [vmem:[#allocation8 + $0x50] sm:$0xff]   ;;  %p2097_p12 = pnand %p2096_p7, %p2493_p1  ;;  %s2101_s23 = scalar_lea.vmem %s2100_s9, 512 }
  0x6f   : > { %v1953_v27 = vld [vmem:[#allocation8 + $0x8] sm:$0xff]   ;;  %v1955_v29 = vld [vmem:[#allocation8] sm:$0xff]   ;;  %v1957_v31 = vld [vmem:[#allocation8 + $0xb8] sm:$0xff]   ;;  %p2102_p13 = scmp.lt.s32.totalorder %s2420_s1, %s2100_s9  ;;  %p2103_p0 = scmp.lt.s32.totalorder %s2101_s23, %s2095_s28 }
  0x70   : > { %1692 = vmatpush3.bf16.msra.mxu0 %v1931_v4  ;;  %v1954_v28 = vld [vmem:[#allocation8 + $0x48] sm:$0xff]   ;;  %v1956_v30 = vld [vmem:[#allocation8 + $0x40] sm:$0xff]   ;;  %v1551_v56 = vld [vmem:[%s2465_s2] ss:$0 sm:$0xff]  ;;  %p2098_p9 = pneg %p2097_p12 }
  0x71   : > { %1704 = vmatpush3.bf16.msra.mxu1 %v1932_v5  ;;  %1693 = vmatprep.subr.bf16.mxu0 %v1933_v6  ;;  %v1958_v4 = vld [vmem:[#allocation8 + $0xb0] sm:$0xff]   ;;  %v1959_v5 = vld [vmem:[#allocation8 + $0xa8] sm:$0xff]   ;;  %v1974_v20 = vld [vmem:[#allocation9 + $0x58] sm:$0xff]   ;;  %p2104_p2 = por %p2103_p0, %p2102_p13 }
  0x72   : > { %1705 = vmatprep.subr.bf16.mxu1 %v1934_v8 }
  0x73   : > { %p2105_p10 = pnand %p2104_p2, %p2098_p9 }
  0x74   : > { %1694 = vmatpush3.bf16.msra.mxu0 %v1933_v6  ;;  %v1960_v6 = vld [vmem:[#allocation8 + $0xa0] sm:$0xff]  }
  0x75   : > { %1706 = vmatpush3.bf16.msra.mxu1 %v1934_v8  ;;  %1711 = vmatprep.subr.bf16.mxu0 %v1937_v9  ;;  %v1962_v8 = vld [vmem:[#allocation8 + $0x90] sm:$0xff]  }
  0x76   : > { %1723 = vmatprep.subr.bf16.mxu1 %v1941_v14 }
  0x77   : > { %1696 = vmatmul.mubr.msk.bf16.vlgmr.msra.gmra.mxu0 %vm390_vm0, %v1936_v10 }
  0x78   : > { %1708 = vmatmul.mubr.msk.bf16.vlgmr.msra.gmra.mxu1 %vm390_vm0, %v1936_v10  ;;  %1712 = vmatpush3.bf16.msra.mxu0 %v1937_v9  ;;  %v1963_v9 = vld [vmem:[#allocation8 + $0x88] sm:$0xff]  }
  0x79   : > { %1713 = vmatprep.subr.bf16.mxu0 %v1938_v11  ;;  %1719 = vmatprep.mubr.msk.bf16.mxu0 %vm390_vm0, %v1935_v7  ;;  %v1961_v7 = vld [vmem:[#allocation8 + $0x98] sm:$0xff]  }
  0x7a   : > { %1724 = vmatpush3.bf16.msra.mxu1 %v1941_v14  ;;  %v1968_v14 = vld [vmem:[#allocation9 + $0x70] sm:$0xff]  }
  0x7b   : > { %1725 = vmatprep.subr.bf16.mxu1 %v1943_v16 }
  0x7c   : > { %1714 = vmatpush3.bf16.msra.mxu0 %v1938_v11  ;;  %v1965_v11 = vld [vmem:[#allocation9 + $0x38] sm:$0xff]  }
  0x7d   : > { %1715 = vmatprep.subr.bf16.mxu0 %v1939_v12 }
  0x7e   : > { %1726 = vmatpush3.bf16.msra.mxu1 %v1943_v16  ;;  %v1970_v16 = vld [vmem:[#allocation9 + $0x68] sm:$0xff]  }
  0x7f   : > { %1727 = vmatprep.subr.bf16.mxu1 %v1945_v18 }
  0x80   : > { %1716 = vmatpush3.bf16.msra.mxu0 %v1939_v12  ;;  %v1966_v12 = vld [vmem:[#allocation9 + $0x78] sm:$0xff]  }
  0x81   : > { %1717 = vmatprep.subr.bf16.mxu0 %v1940_v13 }
  0x82   : > { %1728 = vmatpush3.bf16.msra.mxu1 %v1945_v18  ;;  %v1972_v18 = vld [vmem:[#allocation9 + $0x60] sm:$0xff]  }
  0x83   : > { %1729 = vmatprep.subr.bf16.mxu1 %v1947_v21 }
  0x84   : > { %1718 = vmatpush3.bf16.msra.mxu0 %v1940_v13  ;;  %v1967_v13 = vld [vmem:[#allocation9 + $0x30] sm:$0xff]  }
  0x85   : > { %1743 = vmatprep.subr.bf16.mxu0 %v1942_v15 }
  0x86   : > { %1730 = vmatpush3.bf16.msra.mxu1 %v1947_v21  ;;  %v1975_v21 = vld [vmem:[#allocation9 + $0x10] sm:$0xff]  }
  0x87   : > { %1720 = vmatmul.mubr.msk.bf16.vlgmr.msra.gmra.mxu0 %vm390_vm0, %v1936_v10  ;;  %1731 = vmatprep.subr.bf16.mxu1 %v1949_v23  ;;  %v1964_v10 = vld [vmem:[#allocation8 + $0x80] sm:$0xff]  }
  0x88   : > { %1744 = vmatpush3.bf16.msra.mxu0 %v1942_v15  ;;  %v1969_v15 = vld [vmem:[#allocation9 + $0x28] sm:$0xff]  }
  0x89   : > { %1745 = vmatprep.subr.bf16.mxu0 %v1944_v17 }
  0x8a   : > { %1732 = vmatpush3.bf16.msra.mxu1 %v1949_v23  ;;  %v1977_v23 = vld [vmem:[#allocation9 + $0x8] sm:$0xff]  }
  0x8b   : > { %1733 = vmatprep.subr.bf16.mxu1 %v1951_v25 }
  0x8c   : > { %1746 = vmatpush3.bf16.msra.mxu0 %v1944_v17  ;;  %v1971_v17 = vld [vmem:[#allocation9 + $0x20] sm:$0xff]  }
  0x8d   : > { %1747 = vmatprep.subr.bf16.mxu0 %v1946_v19 }
  0x8e   : > { %1734 = vmatpush3.bf16.msra.mxu1 %v1951_v25  ;;  %v1979_v25 = vld [vmem:[#allocation9] sm:$0xff]  }
  0x8f   : > { %1735 = vmatprep.subr.bf16.mxu1 %v1953_v27 }
  0x90   : > { %1748 = vmatpush3.bf16.msra.mxu0 %v1946_v19  ;;  %v1973_v19 = vld [vmem:[#allocation9 + $0x18] sm:$0xff]  }
  0x91   : > { %1749 = vmatprep.subr.bf16.mxu0 %v1948_v22 }
  0x92   : > { %1736 = vmatpush3.bf16.msra.mxu1 %v1953_v27  ;;  %v1981_v27 = vld [vmem:[#allocation9 + $0xb8] sm:$0xff]  }
  0x93   : > { %1737 = vmatprep.subr.bf16.mxu1 %v1955_v29 }
  0x94   : > { %1750 = vmatpush3.bf16.msra.mxu0 %v1948_v22  ;;  %v1976_v22 = vld [vmem:[#allocation9 + $0x50] sm:$0xff]  }
  0x95   : > { %1751 = vmatprep.subr.bf16.mxu0 %v1950_v24 }
  0x96   : > { %1738 = vmatpush3.bf16.msra.mxu1 %v1955_v29 }
  0x97   : > { %1763 = vmatprep.subr.bf16.mxu1 %v1957_v31 }
  0x98   : > { %1752 = vmatpush3.bf16.msra.mxu0 %v1950_v24  ;;  %v1978_v24 = vld [vmem:[#allocation9 + $0x48] sm:$0xff]  }
  0x99   : > { %1753 = vmatprep.subr.bf16.mxu0 %v1952_v26 }
  0x9c   : > { %1754 = vmatpush3.bf16.msra.mxu0 %v1952_v26  ;;  %v1980_v26 = vld [vmem:[#allocation9 + $0x40] sm:$0xff]  }
  0x9d   : > { %1755 = vmatprep.subr.bf16.mxu0 %v1954_v28 }
  0xa0   : > { %1756 = vmatpush3.bf16.msra.mxu0 %v1954_v28 }
  0xa1   : > { %1757 = vmatprep.subr.bf16.mxu0 %v1956_v30 }
  0xa4   : > { %1758 = vmatpush3.bf16.msra.mxu0 %v1956_v30 }
  0xa5   : > { %1783 = vmatprep.subr.bf16.mxu0 %v1965_v11 }
 0x137   : > { %v1697_v32 = vpop.f32.mrf.mxu0 }
 0x138   : > { %v1709_v33 = vpop.f32.mrf.mxu1 }
 0x139   : > { %v431_v34 = vpop.f32.mrf.mxu0  ;;  %v613_v41 = vrot.slane %v1709_v33, 1 }
 0x13a   : > { %v511_v35 = vpop.f32.mrf.mxu1 }
 0x13b   : > { %v1698_v36 = vpop.f32.mrf.mxu0  ;;  %v610_v42 = vrot.slane %v511_v35, 1 }
 0x13c   : > { %v1710_v37 = vpop.f32.mrf.mxu1 }
 0x13d   : > { %v434_v38 = vpop.f32.mrf.mxu0 }
 0x13e   : > { %v514_v39 = vpop.f32.mrf.mxu1 }
 0x13f   : > { %v611_v43 = vrot.slane %v514_v39, 1 }
 0x141   : > { %v612_v46 = vsel %vm609_vm1, %v610_v42, %v611_v43  ;;  %v614_v47 = vsel %vm609_vm1, %v611_v43, %v613_v41 }
 0x142   : > { %v617_v52 = vadd.f32 %v612_v46, %v431_v34  ;;  %v618_v53 = vadd.f32 %v614_v47, %v434_v38 }
 0x147   : > { %v1721_v40 = vpop.f32.mrf.mxu0 }
 0x148   : > { %v626_v49 = vrot.slane %v1721_v40, 2 }
 0x149   : > { %v592_v44 = vpop.f32.mrf.mxu0 }
 0x14a   : > { %v623_v50 = vrot.slane %v592_v44, 2 }
 0x14b   : > { %v1722_v45 = vpop.f32.mrf.mxu0 }
 0x14d   : > { %v595_v48 = vpop.f32.mrf.mxu0 }
 0x14e   : > { %v624_v51 = vrot.slane %v595_v48, 2 }
 0x150   : > { %v625_v54 = vsel %vm622_vm2, %v623_v50, %v624_v51  ;;  %v627_v55 = vsel %vm622_vm2, %v624_v51, %v626_v49 }
 0x151   : > { %v630_v57 = vadd.f32 %v625_v54, %v617_v52  ;;  %v631_v58 = vadd.f32 %v627_v55, %v618_v53  ;;  %v1576_v52 = vld [vmem:[%s2467_s4] ss:$0 sm:$0xff] }
 0x153   : > { %v639_v59 = vadd.f32 %v1551_v56, %v630_v57  ;;  %v640_v60 = vadd.f32 %v1551_v56, %v631_v58 }
 0x155   : > { %v641_v61 = vmax.f32 %v639_v59, 0.0  ;;  %v642_v62 = vmax.f32 %v640_v60, 0.0 }
 0x157   : > { %643 = vst [vmem:[#allocation2 + $0x1] sm:$0xff] %v641_v61  ;;  %644 = vst [vmem:[#allocation2 + $0x9] sm:$0xff] %v642_v62 }
 0x15e   : > { %v645_v63 = vld [vmem:[#allocation2] sm:$0xff]  ;;  %v646_v0 = vld [vmem:[#allocation2 + $0x8] sm:$0xff]  ;;  %v647_v1 = vld [vmem:[#allocation2 + $0x10] sm:$0xff] }
 0x15f   : > { %v648_v2 = vpack.c.bf16 %v646_v0, %v645_v63  ;;  %v649_v3 = vpack.c.bf16 %v647_v1, %v647_v1  ;;  %v1982_v0 = vld [vmem:[#allocation9 + $0xb0] sm:$0xff]   ;;  %v1983_v1 = vld [vmem:[#allocation9 + $0xa8] sm:$0xff]  }
 0x161   : > { %1739 = vmatprep.mubr.bf16.mxu1 %v648_v2  ;;  %1759 = vmatprep.mubr.bf16.mxu0 %v648_v2 }
 0x162   : > { %1740 = vmatmul.mubr.bf16.vlgmr.msra.gmra.mxu1 %v649_v3  ;;  %1760 = vmatmul.mubr.bf16.vlgmr.msra.gmra.mxu0 %v649_v3 }
 0x163   : > { %1764 = vmatpush3.bf16.msra.mxu1 %v1957_v31  ;;  %1779 = vmatprep.mubr.bf16.mxu1 %v648_v2  ;;  %v1984_v2 = vld [vmem:[#allocation9 + $0xa0] sm:$0xff]  }
 0x164   : > { %1765 = vmatprep.subr.bf16.mxu1 %v1958_v4  ;;  %1784 = vmatpush3.bf16.msra.mxu0 %v1965_v11 }
 0x165   : > { %1785 = vmatprep.subr.bf16.mxu0 %v1967_v13 }
 0x167   : > { %1766 = vmatpush3.bf16.msra.mxu1 %v1958_v4  ;;  %v1986_v4 = vld [vmem:[#allocation9 + $0x90] sm:$0xff]  }
 0x168   : > { %1767 = vmatprep.subr.bf16.mxu1 %v1959_v5  ;;  %1786 = vmatpush3.bf16.msra.mxu0 %v1967_v13 }
 0x169   : > { %1787 = vmatprep.subr.bf16.mxu0 %v1969_v15 }
 0x16b   : > { %1768 = vmatpush3.bf16.msra.mxu1 %v1959_v5  ;;  %v1987_v5 = vld [vmem:[#allocation9 + $0x88] sm:$0xff]  }
 0x16c   : > { %1769 = vmatprep.subr.bf16.mxu1 %v1960_v6  ;;  %1788 = vmatpush3.bf16.msra.mxu0 %v1969_v15 }
 0x16d   : > { %1789 = vmatprep.subr.bf16.mxu0 %v1971_v17 }
 0x16f   : > { %1770 = vmatpush3.bf16.msra.mxu1 %v1960_v6  ;;  %v1988_v6 = vld [vmem:[#allocation9 + $0x80] sm:$0xff]  }
 0x170   : > { %1771 = vmatprep.subr.bf16.mxu1 %v1961_v7  ;;  %1790 = vmatpush3.bf16.msra.mxu0 %v1971_v17 }
 0x171   : > { %1791 = vmatprep.subr.bf16.mxu0 %v1973_v19 }
 0x173   : > { %1772 = vmatpush3.bf16.msra.mxu1 %v1961_v7 }
 0x174   : > { %1773 = vmatprep.subr.bf16.mxu1 %v1962_v8  ;;  %1792 = vmatpush3.bf16.msra.mxu0 %v1973_v19 }
 0x175   : > { %1793 = vmatprep.subr.bf16.mxu0 %v1975_v21 }
 0x177   : > { %1774 = vmatpush3.bf16.msra.mxu1 %v1962_v8 }
 0x178   : > { %1775 = vmatprep.subr.bf16.mxu1 %v1963_v9  ;;  %1794 = vmatpush3.bf16.msra.mxu0 %v1975_v21 }
 0x179   : > { %1795 = vmatprep.subr.bf16.mxu0 %v1977_v23 }
 0x17b   : > { %1776 = vmatpush3.bf16.msra.mxu1 %v1963_v9 }
 0x17c   : > { %1777 = vmatprep.subr.bf16.mxu1 %v1964_v10  ;;  %1796 = vmatpush3.bf16.msra.mxu0 %v1977_v23 }
 0x17d   : > { %1797 = vmatprep.subr.bf16.mxu0 %v1979_v25 }
 0x17f   : > { %1778 = vmatpush3.bf16.msra.mxu1 %v1964_v10 }
 0x180   : > { %1803 = vmatprep.subr.bf16.mxu1 %v1966_v12  ;;  %1798 = vmatpush3.bf16.msra.mxu0 %v1979_v25 }
 0x181   : > { %1823 = vmatprep.subr.bf16.mxu0 %v1981_v27 }
 0x182   : > { %1780 = vmatmul.mubr.bf16.vlgmr.msra.gmra.mxu1 %v649_v3  ;;  %v1985_v3 = vld [vmem:[#allocation9 + $0x98] sm:$0xff]  }
 0x183   : > { %1804 = vmatpush3.bf16.msra.mxu1 %v1966_v12 }
 0x184   : > { %1805 = vmatprep.subr.bf16.mxu1 %v1968_v14 }
 0x187   : > { %1806 = vmatpush3.bf16.msra.mxu1 %v1968_v14 }
 0x188   : > { %1807 = vmatprep.subr.bf16.mxu1 %v1970_v16 }
 0x18b   : > { %1808 = vmatpush3.bf16.msra.mxu1 %v1970_v16 }
 0x18c   : > { %1809 = vmatprep.subr.bf16.mxu1 %v1972_v18 }
 0x18f   : > { %1810 = vmatpush3.bf16.msra.mxu1 %v1972_v18 }
 0x190   : > { %1811 = vmatprep.subr.bf16.mxu1 %v1974_v20 }
 0x193   : > { %1812 = vmatpush3.bf16.msra.mxu1 %v1974_v20 }
 0x194   : > { %1813 = vmatprep.subr.bf16.mxu1 %v1976_v22 }
 0x197   : > { %1814 = vmatpush3.bf16.msra.mxu1 %v1976_v22 }
 0x198   : > { %1815 = vmatprep.subr.bf16.mxu1 %v1978_v24 }
 0x19b   : > { %1816 = vmatpush3.bf16.msra.mxu1 %v1978_v24 }
 0x19c   : > { %1817 = vmatprep.subr.bf16.mxu1 %v1980_v26 }
 0x19f   : > { %1818 = vmatpush3.bf16.msra.mxu1 %v1980_v26 }
 0x222   : > { %v1741_v28 = vpop.f32.mrf.mxu1  ;;  %v1761_v29 = vpop.f32.mrf.mxu0 }
 0x223   : > { %v993_v39 = vrot.slane %v1761_v29, 1 }
 0x224   : > { %v748_v30 = vpop.f32.mrf.mxu1  ;;  %v860_v31 = vpop.f32.mrf.mxu0 }
 0x225   : > { %v990_v40 = vrot.slane %v860_v31, 1  ;;  %v1601_v31 = vld [vmem:[%s2469_s6] ss:$0 sm:$0xff] }
 0x226   : > { %v1742_v32 = vpop.f32.mrf.mxu1  ;;  %v1762_v33 = vpop.f32.mrf.mxu0 }
 0x228   : > { %v751_v34 = vpop.f32.mrf.mxu1  ;;  %v863_v35 = vpop.f32.mrf.mxu0 }
 0x229   : > { %v991_v37 = vrot.slane %v863_v35, 1 }
 0x22b   : > { %v992_v42 = vsel %vm609_vm1, %v990_v40, %v991_v37  ;;  %v994_v43 = vsel %vm609_vm1, %v991_v37, %v993_v39 }
 0x22c   : > { %v997_v48 = vadd.f32 %v992_v42, %v748_v30  ;;  %v998_v49 = vadd.f32 %v994_v43, %v751_v34 }
 0x242   : > { %v1781_v36 = vpop.f32.mrf.mxu1 }
 0x243   : > { %v1005_v45 = vrot.slane %v1781_v36, 2 }
 0x244   : > { %v973_v38 = vpop.f32.mrf.mxu1 }
 0x245   : > { %v1002_v46 = vrot.slane %v973_v38, 2 }
 0x246   : > { %v1782_v41 = vpop.f32.mrf.mxu1 }
 0x248   : > { %v976_v44 = vpop.f32.mrf.mxu1 }
 0x249   : > { %v1003_v47 = vrot.slane %v976_v44, 2 }
 0x24b   : > { %v1004_v50 = vsel %vm622_vm2, %v1002_v46, %v1003_v47  ;;  %v1006_v51 = vsel %vm622_vm2, %v1003_v47, %v1005_v45 }
 0x24c   : > { %v1009_v53 = vadd.f32 %v1004_v50, %v997_v48  ;;  %v1010_v54 = vadd.f32 %v1006_v51, %v998_v49 }
 0x24e   : > { %v1018_v55 = vadd.f32 %v1576_v52, %v1009_v53  ;;  %v1019_v56 = vadd.f32 %v1576_v52, %v1010_v54 }
 0x250   : > { %v1020_v57 = vmax.f32 %v1018_v55, 0.0  ;;  %v1021_v58 = vmax.f32 %v1019_v56, 0.0 }
 0x252   : > { %1022 = vst [vmem:[#allocation2 + $0x1] sm:$0xff] %v1020_v57  ;;  %1023 = vst [vmem:[#allocation2 + $0x9] sm:$0xff] %v1021_v58 }
 0x259   : > { %v1024_v59 = vld [vmem:[#allocation2] sm:$0xff]  ;;  %v1025_v60 = vld [vmem:[#allocation2 + $0x8] sm:$0xff]  ;;  %v1026_v61 = vld [vmem:[#allocation2 + $0x10] sm:$0xff] }
 0x25a   : > { %v1027_v62 = vpack.c.bf16 %v1025_v60, %v1024_v59  ;;  %v1028_v63 = vpack.c.bf16 %v1026_v61, %v1026_v61 }
 0x25c   : > { %1799 = vmatprep.mubr.bf16.mxu0 %v1027_v62  ;;  %1819 = vmatprep.mubr.bf16.mxu1 %v1027_v62 }
 0x25d   : > { %1800 = vmatmul.mubr.bf16.vlgmr.msra.gmra.mxu0 %v1028_v63  ;;  %1820 = vmatmul.mubr.bf16.vlgmr.msra.gmra.mxu1 %v1028_v63 }
 0x25e   : > { %1824 = vmatpush3.bf16.msra.mxu0 %v1981_v27  ;;  %1839 = vmatprep.mubr.bf16.mxu0 %v1027_v62 }
 0x25f   : > { %1825 = vmatprep.subr.bf16.mxu0 %v1982_v0 }
 0x262   : > { %1826 = vmatpush3.bf16.msra.mxu0 %v1982_v0 }
 0x263   : > { %1827 = vmatprep.subr.bf16.mxu0 %v1983_v1 }
 0x266   : > { %1828 = vmatpush3.bf16.msra.mxu0 %v1983_v1 }
 0x267   : > { %1829 = vmatprep.subr.bf16.mxu0 %v1984_v2 }
 0x26a   : > { %1830 = vmatpush3.bf16.msra.mxu0 %v1984_v2 }
 0x26b   : > { %1831 = vmatprep.subr.bf16.mxu0 %v1985_v3 }
 0x26e   : > { %1832 = vmatpush3.bf16.msra.mxu0 %v1985_v3 }
 0x26f   : > { %1833 = vmatprep.subr.bf16.mxu0 %v1986_v4 }
 0x272   : > { %1834 = vmatpush3.bf16.msra.mxu0 %v1986_v4 }
 0x273   : > { %1835 = vmatprep.subr.bf16.mxu0 %v1987_v5 }
 0x276   : > { %1836 = vmatpush3.bf16.msra.mxu0 %v1987_v5 }
 0x277   : > { %1837 = vmatprep.subr.bf16.mxu0 %v1988_v6 }
 0x27a   : > { %1838 = vmatpush3.bf16.msra.mxu0 %v1988_v6 }
 0x27d   : > { %1840 = vmatmul.mubr.bf16.vlgmr.msra.gmra.mxu0 %v1028_v63 }
 0x31d   : > { %v1801_v7 = vpop.f32.mrf.mxu0  ;;  %v1821_v8 = vpop.f32.mrf.mxu1 }
 0x31e   : > { %v1372_v18 = vrot.slane %v1821_v8, 1 }
 0x31f   : > { %v1127_v9 = vpop.f32.mrf.mxu0  ;;  %v1239_v10 = vpop.f32.mrf.mxu1 }
 0x320   : > { %v1369_v19 = vrot.slane %v1239_v10, 1 }
 0x321   : > { %v1802_v11 = vpop.f32.mrf.mxu0  ;;  %v1822_v12 = vpop.f32.mrf.mxu1 }
 0x323   : > { %v1130_v13 = vpop.f32.mrf.mxu0  ;;  %v1242_v14 = vpop.f32.mrf.mxu1 }
 0x324   : > { %v1370_v16 = vrot.slane %v1242_v14, 1 }
 0x326   : > { %v1371_v21 = vsel %vm609_vm1, %v1369_v19, %v1370_v16  ;;  %v1373_v22 = vsel %vm609_vm1, %v1370_v16, %v1372_v18 }
 0x327   : > { %v1376_v27 = vadd.f32 %v1371_v21, %v1127_v9  ;;  %v1377_v28 = vadd.f32 %v1373_v22, %v1130_v13 }
 0x33d   : > { %v1841_v15 = vpop.f32.mrf.mxu0 }
 0x33e   : > { %v1384_v24 = vrot.slane %v1841_v15, 2 }
 0x33f   : > { %v1352_v17 = vpop.f32.mrf.mxu0 }
 0x340   : > { %v1381_v25 = vrot.slane %v1352_v17, 2 }
 0x341   : > { %v1842_v20 = vpop.f32.mrf.mxu0 }
 0x343   : > { %v1355_v23 = vpop.f32.mrf.mxu0 }
 0x344   : > { %v1382_v26 = vrot.slane %v1355_v23, 2 }
 0x346   : > { %v1383_v29 = vsel %vm622_vm2, %v1381_v25, %v1382_v26  ;;  %v1385_v30 = vsel %vm622_vm2, %v1382_v26, %v1384_v24 }
 0x347   : > { %v1388_v32 = vadd.f32 %v1383_v29, %v1376_v27  ;;  %v1389_v33 = vadd.f32 %v1385_v30, %v1377_v28 }
 0x349   : > { %v1397_v34 = vadd.f32 %v1601_v31, %v1388_v32  ;;  %v1398_v35 = vadd.f32 %v1601_v31, %v1389_v33 }
 0x34b   : > { %v1399_v36 = vmax.f32 %v1397_v34, 0.0  ;;  %v1400_v37 = vmax.f32 %v1398_v35, 0.0 }
 0x34d   : > { %1401 = vst [vmem:[%s340_s19] sm:$0xff] %v1399_v36  ;;  %1402 = vst [vmem:[%s340_s19 + $0x8] sm:$0xff] %v1400_v37 }
 0x34e   : > { %2108 = shalt.err (!%p2105_p10)
}
 0x34f   : > { %s2109_s11 = scalar_lea.hbm %s2418_s10, 256  ;;  %s2113_s16 = scalar_lea.hbm %s2470_s7, 512 }
 0x350   : > { %p2110_p6 = scmp.ne.s32.totalorder %s2418_s10, %s2109_s11  ;;  %p2114_p3 = scmp.lt.s32.totalorder %s2418_s10, %s2470_s7 }
 0x351   : > { %p2115_p11 = scmp.lt.s32.totalorder %s2113_s16, %s2109_s11 }
 0x352   : > { %p2111_p4 = pnand %p2110_p6, %p2493_p1 }
 0x353   : > { %p2116_p5 = por %p2115_p11, %p2114_p3 }
 0x354   : > { %p2112_p8 = pneg %p2111_p4 }
 0x356   : > { %p2117_p7 = pnand %p2116_p5, %p2112_p8 }
 0x358   : > { %2120 = shalt.err (!%p2117_p7)
}
 0x359   : > { %s2177_s18 = smov 128   ;;  %s2178_s22 = smov 8  }
 0x35a   : > { %1859 = dma.vmem_to_hbm [thread:$0]  (%p2493_p1), %s2420_s1, 256, %s2418_s10, %s1404_s21, %s2177_s18, %s2177_s18, %s2178_s22  }
 0x35b PF: > { %s1432_s28 = sand.u32 1, %s2155_s24   ;;  %p2494_p12 = scmp.ne.s32.totalorder %s2479_s8, 0 }
 0x35c   : > { %p2495_p9 = scmp.ge.s32.totalorder %s2167_s27, 2  ;;  %s1433_s30 = scalar_lea.sflag [#allocation5], %s1432_s28 }
 0x35e   : > { %p1876_p13 = pnand %p2495_p9, %p2494_p12 }
 0x360   : > { %p1877_p0 = pneg %p1876_p13 }
 0x362   : > { %2150 = dma.done.wait (%p1877_p0), %s1433_s30, 256  }
 0x363   : > { %2152 = vsyncadd (%p1877_p0), %s1433_s30, 4294967040  ;;  %p22_p2 = scmp.ge.s32.totalorder %s2308_s14, 4   ;;  %s2496_s24 = smov %s2159_s25 }
 0x364   : > { %s2497_s25 = smov %s2163_s26  ;;  %s2498_s26 = smov %s2318_s17 }
 0x365   : > { %s2499_s27 = smov %s2308_s14  ;;  %24 = sbr.rel (!%p22_p2) target bundleno = 9 (0x9), region = 111 }
 0x36a   :  { %1438 = vsyncpa [#allocation4], 1 }
 0x36b   :  { %1440 = vsyncpa [#allocation4 + $0x1], 1 }
 0x36c   :  { %1441 = vsyncpa [#allocation7], 1 }
 0x36d   :  { %1442 = vsyncpa [#allocation10], 1 }
 0x36e   :  { %1443 = vsyncpa [#allocation5], 1 }
 0x36f   :  { %1445 = vsyncpa [#allocation5 + $0x1], 1 }

</bundles_post_ra>
